<compile_context>
chip_gen: v6e
topology: v6e:2x2x1
jax: 0.10.0
libtpu: 0.0.40
codegen_flags: <defaults>
</compile_context>

<pallas_src>
import functools
from math import ceil

import jax
import jax.numpy as jnp
from jax.experimental import pallas as pl
from jax.experimental.pallas import tpu as pltpu


# ----------------------------------------------------------------- helpers
def _round_up(x, m):
    return ((x + m - 1) // m) * m


def _row_tile(n, target=512):
    """Largest row tile <= target that evenly divides n and is a multiple of 8
    (or n itself when n <= target / no divisor exists)."""
    target = max(8, target)
    if n <= target:
        return n
    for t in range(target, 7, -1):
        if n % t == 0 and t % 8 == 0:
            return t
    return n


# ----------------------------------------------------------------- Pallas kernels
def _knn_kernel(prow_ref, pall_ref, psq_ref, idx_ref, *, K):
    """Fused pairwise-distance + top-K (smallest) neighbor selection.
       score[i, j] = ||p_j||^2 - 2 p_i . p_j   (same ordering as squared distance)."""
    pr = prow_ref[...]                                   # (TN, D)
    pa = pall_ref[...]                                   # (N, D)
    gram = jax.lax.dot_general(pr, pa, (((1,), (1,)), ((), ())),
                               preferred_element_type=jnp.float32)   # (TN, N)
    score = psq_ref[...] - 2.0 * gram                    # (TN, N)
    TN, N = score.shape
    colf = jax.lax.broadcasted_iota(jnp.int32, (TN, N), 1).astype(jnp.float32)
    picks = []
    for _ in range(K):
        m = jnp.min(score, axis=1, keepdims=True)
        sel = jnp.min(jnp.where(score <= m, colf, jnp.float32(N)),
                      axis=1, keepdims=True)             # (TN, 1), smallest index on ties
        picks.append(sel)
        score = jnp.where(colf == sel, jnp.inf, score)
    idx_ref[...] = jnp.concatenate(picks, axis=1).astype(jnp.int32)


def knn_topk(pos_b, *, K):
    B, N, D = pos_b.shape
    # bound the (TN, N) in-kernel score block to a few MiB (v7x has only 64 MiB VMEM)
    TN = _row_tile(N, min(1024, max(8, (4 << 20) // max(4 * N, 1))))
    psq = jnp.sum(pos_b * pos_b, axis=-1).reshape(B, 1, N)
    kernel = functools.partial(_knn_kernel, K=K)
    return pl.pallas_call(
        kernel,
        out_shape=jax.ShapeDtypeStruct((B, N, K), jnp.int32),
        grid=(B, N // TN),
        in_specs=[
            pl.BlockSpec((None, TN, D), lambda b, i: (b, i, 0)),
            pl.BlockSpec((None, N, D), lambda b, i: (b, 0, 0)),
            pl.BlockSpec((None, 1, N), lambda b, i: (b, 0, 0)),
        ],
        out_specs=pl.BlockSpec((None, TN, K), lambda b, i: (b, i, 0)),
        compiler_params=pltpu.CompilerParams(
            dimension_semantics=("parallel", "parallel")),
    )(pos_b, pos_b, psq)


def _xconv_core_kernel(xs_ref, t_ref, wdw_ref, bdw_ref, wlin_ref, blin_ref, o_ref,
                       *, K, Cc, dm):
    """PointCNN X-transform core for one row tile of TP points:
         xt[p, c, j] = sum_k x_star[p, k, c] * T[p, k*K + j]
         dw[p, j, c] = sum_k xt[p, c, k] * Wdw[j*K + k, c] + bdw[j, c]
         out[p, :]   = concat_j(dw[p, j, :]) @ Wlin + blin      (single bf16 MXU matmul)
    """
    xs = xs_ref[...]                                     # (TP, K*Cc) f32
    t = t_ref[...]                                       # (TP, K*K)  f32
    wdw = wdw_ref[...]                                   # (dm*K, Cc) f32
    # Interleave xt and depthwise accumulation to keep the live set small.
    dw = [None] * dm
    for jx in range(K):
        acc = xs[:, 0:Cc] * t[:, jx:jx + 1]
        for k in range(1, K):
            acc = acc + xs[:, k * Cc:(k + 1) * Cc] * t[:, k * K + jx:k * K + jx + 1]
        for j in range(dm):
            contrib = acc * wdw[j * K + jx:j * K + jx + 1, :]
            dw[j] = contrib if dw[j] is None else dw[j] + contrib
    dw_all = jnp.concatenate([dw[j] + bdw_ref[j:j + 1, :] for j in range(dm)],
                             axis=1)                     # (TP, dm*Cc)
    out = jnp.dot(dw_all.astype(jnp.bfloat16), wlin_ref[...],
                  preferred_element_type=jnp.float32)    # (TP, C1p)
    o_ref[...] = out + blin_ref[...]


def xconv_core(xs_flat, t, wdw, bdw, wlin_p, blin_p, *, K, Cc, dm, c1p):
    P = xs_flat.shape[0]
    TP = _row_tile(P, 256)
    kernel = functools.partial(_xconv_core_kernel, K=K, Cc=Cc, dm=dm)
    return pl.pallas_call(
        kernel,
        out_shape=jax.ShapeDtypeStruct((P, c1p), jnp.float32),
        grid=(P // TP,),
        in_specs=[
            pl.BlockSpec((TP, K * Cc), lambda i: (i, 0)),
            pl.BlockSpec((TP, K * K), lambda i: (i, 0)),
            pl.BlockSpec((dm * K, Cc), lambda i: (0, 0)),
            pl.BlockSpec((dm, Cc), lambda i: (0, 0)),
            pl.BlockSpec((dm * Cc, c1p), lambda i: (0, 0)),
            pl.BlockSpec((1, c1p), lambda i: (0, 0)),
        ],
        out_specs=pl.BlockSpec((TP, c1p), lambda i: (i, 0)),
        compiler_params=pltpu.CompilerParams(dimension_semantics=("parallel",)),
    )(xs_flat, t, wdw, bdw, wlin_p, blin_p)


def _fc_kernel(g_ref, w1_ref, b1_ref, w2_ref, b2_ref, o_ref):
    """fc: Linear -> ReLU -> Linear over a row tile of gathered features (bf16 MXU)."""
    h = jnp.dot(g_ref[...].astype(jnp.bfloat16), w1_ref[...],
                preferred_element_type=jnp.float32) + b1_ref[...]
    h = jnp.maximum(h, 0.0)
    h = jnp.dot(h.astype(jnp.bfloat16), w2_ref[...],
                preferred_element_type=jnp.float32) + b2_ref[...]
    o_ref[...] = h


def head_fc(g, w1, b1, w2, b2):
    R, c1p = g.shape
    C2 = w1.shape[1]
    cop = w2.shape[1]
    TR = _row_tile(R, 512)
    return pl.pallas_call(
        _fc_kernel,
        out_shape=jax.ShapeDtypeStruct((R, cop), jnp.float32),
        grid=(R // TR,),
        in_specs=[
            pl.BlockSpec((TR, c1p), lambda i: (i, 0)),
            pl.BlockSpec((c1p, C2), lambda i: (0, 0)),
            pl.BlockSpec((1, C2), lambda i: (0, 0)),
            pl.BlockSpec((C2, cop), lambda i: (0, 0)),
            pl.BlockSpec((1, cop), lambda i: (0, 0)),
        ],
        out_specs=pl.BlockSpec((TR, cop), lambda i: (i, 0)),
        compiler_params=pltpu.CompilerParams(dimension_semantics=("parallel",)),
    )(g, w1, b1, w2, b2)


def _conv_kernel(h_ref, wc_ref, bc_ref, o_ref):
    """Conv2d(L, L, (4,1)) lowered to a per-batch matmul W[L, L*4] @ h[L*4, Cop]."""
    o_ref[...] = jnp.dot(wc_ref[...], h_ref[...].astype(jnp.bfloat16),
                         preferred_element_type=jnp.float32) + bc_ref[...]


def head_conv(h_b, wc, bc):
    B, M, cop = h_b.shape
    L = wc.shape[0]
    return pl.pallas_call(
        _conv_kernel,
        out_shape=jax.ShapeDtypeStruct((B, L, cop), jnp.float32),
        grid=(B,),
        in_specs=[
            pl.BlockSpec((None, M, cop), lambda b: (b, 0, 0)),
            pl.BlockSpec((L, M), lambda b: (0, 0)),
            pl.BlockSpec((L, 1), lambda b: (0, 0)),
        ],
        out_specs=pl.BlockSpec((None, L, cop), lambda b: (b, 0, 0)),
        compiler_params=pltpu.CompilerParams(dimension_semantics=("parallel",)),
    )(h_b, wc, bc)


# ----------------------------------------------------------------------- JAX glue
def _elu(x):
    return jnp.where(x > 0, x, jnp.expm1(x))


def _bn(x, eps=1e-5):
    # BatchNorm1d in (default) training mode; affine params at default init (gamma=1, beta=0).
    m = jnp.mean(x, axis=0, keepdims=True)
    v = jnp.mean((x - m) ** 2, axis=0, keepdims=True)
    return (x - m) * jax.lax.rsqrt(v + eps)


def init_params(key, *, C_in, C_mid1, C_mid2, C_out, n_points, K=4, D=3):
    hid = max(C_in // 4, 2)
    Cc = C_in + hid
    dm = ceil(C_mid1 / Cc)
    L = ceil(n_points / 4)
    shapes = dict(
        m1_w1=(hid, D), m1_b1=(hid,),
        m1_w2=(hid, hid), m1_b2=(hid,),
        m2_w1=(K * K, D * K), m2_b1=(K * K,),
        m2_cw1=(K * K, 1, K), m2_cb1=(K * K,),
        m2_cw2=(K * K, 1, K), m2_cb2=(K * K,),
        xc_dw_w=(Cc * dm, 1, K), xc_dw_b=(Cc * dm,),
        xc_lin_w=(C_mid1, Cc * dm), xc_lin_b=(C_mid1,),
        fc_w1=(C_mid2, C_mid1), fc_b1=(C_mid2,),
        fc_w2=(C_out, C_mid2), fc_b2=(C_out,),
        conv_w=(L, L, 4, 1), conv_b=(L,),
    )
    params = {}
    names = sorted(shapes)
    keys = jax.random.split(key, len(names))
    for k_, name in zip(keys, names):
        params[name] = 0.1 * jax.random.normal(k_, shapes[name], dtype=jnp.float32)
    return params


def xconvolution_forward(params, x, p, batch, *, C_in, C_mid1, C_mid2, C_out, n_points):
    B, N, _ = x.shape
    K = 4
    D = p.shape[-1]
    L = ceil(n_points / 4)
    M = L * 4
    hid = max(C_in // 4, 2)
    Cc = C_in + hid
    dm = ceil(C_mid1 / Cc)
    P = B * N
    C1p = _round_up(C_mid1, 128)      # lane-dense xconv output / fc input width
    Cop = _round_up(C_out, 128)       # lane-dense head output width

    pos = p.reshape(P, D).astype(jnp.float32)
    feats = x.reshape(P, C_in).astype(jnp.float32)
    # `batch` is assumed contiguous ([0]*N, [1]*N, ...) — the reference forward's own
    # .view(B*N, ...) already requires this layout.
    del batch

    # --- farthest point sampling ---
    # TODO(synk): torch_cluster.fps(random_start=True) is stochastic / data-dependent;
    # we use the module's own deterministic `_fps` (first ceil(N/4) points per batch).
    idx = (jnp.arange(L)[None, :] + N * jnp.arange(B)[:, None]).reshape(-1)       # (B*L,)

    # --- fused pairwise-distance + top-K kernel (no (B,N,N) matrix in HBM) ---
    pos_b = pos.reshape(B, N, D)
    nbr_local = knn_topk(pos_b, K=K)                                              # (B, N, K)
    off = (N * jnp.arange(B))[:, None, None]
    nbr = (nbr_local + off).reshape(P, K)                                         # graph for XConv
    # knn of the full cloud for the sampled queries == rows 0..L-1 of the same table
    knn_idx = (nbr_local[:, :L, :] + off).reshape(-1)                             # (B*L*K,)

    # ---------------- XConv (torch_geometric.nn.XConv semantics) ------------------
    rel = pos[nbr] - pos[:, None, :]                                              # (P, K, D)

    # mlp1: Lin -> ELU -> BN -> Lin -> ELU -> BN   (tiny, kept in JAX glue)
    h = rel.reshape(P * K, D)
    h = _bn(_elu(h @ params["m1_w1"].T + params["m1_b1"]))
    h = _bn(_elu(h @ params["m1_w2"].T + params["m1_b2"]))
    x_delta = h.reshape(P, K, hid)
    x_star = jnp.concatenate([x_delta, feats[nbr]], axis=-1)                      # (P, K, Cc)

    # mlp2 -> X-transform matrix T   (tiny, kept in JAX glue)
    t = rel.reshape(P, K * D)
    t = _bn(_elu(t @ params["m2_w1"].T + params["m2_b1"]))                        # (P, K*K)
    w = params["m2_cw1"][:, 0, :].reshape(K, K, K)
    t = jnp.einsum("pgt,gjt->pgj", t.reshape(P, K, K), w).reshape(P, K * K) + params["m2_cb1"]
    t = _bn(_elu(t))
    w = params["m2_cw2"][:, 0, :].reshape(K, K, K)
    t = jnp.einsum("pgt,gjt->pgj", t.reshape(P, K, K), w).reshape(P, K * K) + params["m2_cb2"]
    t = _bn(t)                                                                    # (P, K*K), col k*K+j

    # X-transform + depthwise Conv1d + final Linear  (Pallas hot path, row-tiled)
    wdw_r = params["xc_dw_w"][:, 0, :].reshape(Cc, dm, K).transpose(1, 2, 0).reshape(dm * K, Cc)
    bdw_r = params["xc_dw_b"].reshape(Cc, dm).T                                   # (dm, Cc)
    wlin_r = (params["xc_lin_w"].T.reshape(Cc, dm, C_mid1)
              .transpose(1, 0, 2).reshape(dm * Cc, C_mid1))
    wlin_p = jnp.zeros((dm * Cc, C1p), jnp.float32).at[:, :C_mid1].set(wlin_r).astype(jnp.bfloat16)
    blin_p = jnp.zeros((1, C1p), jnp.float32).at[:, :C_mid1].set(params["xc_lin_b"][None, :])

    xs_flat = x_star.reshape(P, K * Cc)                    # free reshape, no HBM transpose
    xconv_out = xconv_core(xs_flat, t, wdw_r, bdw_r, wlin_p, blin_p,
                           K=K, Cc=Cc, dm=dm, c1p=C1p)     # (P, C1p) f32, cols >= C_mid1 are 0

    # ---------------- gather -> fc -> Conv2d head -------------------------------
    # TODO(synk): the knn_idx gather could be fused into head_fc via
    # PrefetchScalarGridSpec + a pl.Element row-gather BlockSpec; kept as an XLA gather.
    g = xconv_out[knn_idx]                                                        # (B*M, C1p)

    w1_p = (jnp.zeros((C1p, C_mid2), jnp.float32)
            .at[:C_mid1, :].set(params["fc_w1"].T).astype(jnp.bfloat16))
    b1 = params["fc_b1"].reshape(1, C_mid2)
    w2_p = (jnp.zeros((C_mid2, Cop), jnp.float32)
            .at[:, :C_out].set(params["fc_w2"].T).astype(jnp.bfloat16))
    b2_p = jnp.zeros((1, Cop), jnp.float32).at[:, :C_out].set(params["fc_b2"][None, :])

    h_fc = head_fc(g, w1_p, b1, w2_p, b2_p)                                       # (B*M, Cop)
    h_b = h_fc.reshape(B, M, Cop)

    wc = params["conv_w"].reshape(L, L * 4).astype(jnp.bfloat16)
    bc = params["conv_b"].reshape(L, 1)
    out_p = head_conv(h_b, wc, bc)                                                # (B, L, Cop)
    out = out_p[:, :, :C_out]
    return out, pos[idx]


if __name__ == "__main__":
    B, N, C_in = 2, 16, 8
    C_mid1, C_mid2, C_out = 32, 64, 16
    n_points = N

    key = jax.random.PRNGKey(0)
    kp, kx, kpos = jax.random.split(key, 3)
    params = init_params(kp, C_in=C_in, C_mid1=C_mid1, C_mid2=C_mid2,
                         C_out=C_out, n_points=n_points)
    x = jax.random.normal(kx, (B, N, C_in), dtype=jnp.float32)
    p = jax.random.normal(kpos, (B, N, 3), dtype=jnp.float32)
    batch = jnp.repeat(jnp.arange(B, dtype=jnp.int32), N)

    out, sampled_pos = xconvolution_forward(
        params, x, p, batch,
        C_in=C_in, C_mid1=C_mid1, C_mid2=C_mid2, C_out=C_out, n_points=n_points)
    jax.block_until_ready((out, sampled_pos))
    L = ceil(n_points / 4)
    assert out.shape == (B, L, C_out), out.shape
    assert sampled_pos.shape == (B * L, 3), sampled_pos.shape
    print("KERNEL_OK")
</pallas_src>

<mosaic_0001>
module attributes {stable_mosaic.version = 11 : i64} {
  func.func @_knn_kernel(%arg0: i32, %arg1: i32, %arg2: memref<1x16x3xf32, #tpu.memory_space<vmem>>, %arg3: memref<1x16x3xf32, #tpu.memory_space<vmem>>, %arg4: memref<1x1x16xf32, #tpu.memory_space<vmem>>, %arg5: memref<1x16x4xi32, #tpu.memory_space<vmem>>) attributes {dimension_semantics = [#tpu.dimension_semantics<parallel>, #tpu.dimension_semantics<parallel>], iteration_bounds = array<i64: 2, 1>, scalar_prefetch = 0 : i64, scratch_operands = 0 : i64, tpu.core_type = #tpu.core_type<tc>, window_params = [{transform_indices = @transform_0, window_bounds = array<i64: 1, 16, 3>}, {transform_indices = @transform_1, window_bounds = array<i64: 1, 16, 3>}, {transform_indices = @transform_2, window_bounds = array<i64: 1, 1, 16>}, {transform_indices = @transform_3, window_bounds = array<i64: 1, 16, 4>}]} {
    %c0 = arith.constant 0 : index
    %c0_0 = arith.constant 0 : index
    %c0_1 = arith.constant 0 : index
    %0 = vector.load %arg2[%c0, %c0_0, %c0_1] : memref<1x16x3xf32, #tpu.memory_space<vmem>>, vector<1x16x3xf32>
    %1 = vector.shape_cast %0 : vector<1x16x3xf32> to vector<16x3xf32>
    %c0_2 = arith.constant 0 : index
    %c0_3 = arith.constant 0 : index
    %c0_4 = arith.constant 0 : index
    %2 = vector.load %arg3[%c0_2, %c0_3, %c0_4] : memref<1x16x3xf32, #tpu.memory_space<vmem>>, vector<1x16x3xf32>
    %3 = vector.shape_cast %2 : vector<1x16x3xf32> to vector<16x3xf32>
    %cst = arith.constant dense<0.000000e+00> : vector<16x16xf32>
    %4 = tpu.matmul %1, %3, %cst {dimension_numbers = #tpu.dot_dimension_numbers<[1], [1], [0], [0], [0, 0, 1, 0], [], []>} : vector<16x3xf32>, vector<16x3xf32>, vector<16x16xf32> -> vector<16x16xf32>
    %c0_5 = arith.constant 0 : index
    %c0_6 = arith.constant 0 : index
    %c0_7 = arith.constant 0 : index
    %5 = vector.load %arg4[%c0_5, %c0_6, %c0_7] : memref<1x1x16xf32, #tpu.memory_space<vmem>>, vector<1x1x16xf32>
    %6 = vector.shape_cast %5 : vector<1x1x16xf32> to vector<1x16xf32>
    %cst_8 = arith.constant 2.000000e+00 : f32
    %7 = vector.broadcast %cst_8 : f32 to vector<16x16xf32>
    %8 = arith.mulf %7, %4 : vector<16x16xf32>
    %9 = vector.broadcast %6 : vector<1x16xf32> to vector<16x16xf32>
    %10 = arith.subf %9, %8 : vector<16x16xf32>
    %11 = tpu.iota {dimensions = array<i32: 1>} : vector<16x16xi32>
    %12 = arith.sitofp %11 : vector<16x16xi32> to vector<16x16xf32>
    %cst_9 = arith.constant dense<0x7F800000> : vector<16xf32>
    %13 = vector.multi_reduction <minimumf>, %10, %cst_9 [1] : vector<16x16xf32> to vector<16xf32>
    %14 = vector.shape_cast %13 : vector<16xf32> to vector<16x1xf32>
    %15 = vector.broadcast %14 : vector<16x1xf32> to vector<16x16xf32>
    %16 = arith.cmpf ole, %10, %15 : vector<16x16xf32>
    %cst_10 = arith.constant 1.600000e+01 : f32
    %17 = vector.broadcast %cst_10 : f32 to vector<16x16xf32>
    %18 = arith.select %16, %12, %17 : vector<16x16xi1>, vector<16x16xf32>
    %cst_11 = arith.constant dense<0x7F800000> : vector<16xf32>
    %19 = vector.multi_reduction <minimumf>, %18, %cst_11 [1] : vector<16x16xf32> to vector<16xf32>
    %20 = vector.shape_cast %19 : vector<16xf32> to vector<16x1xf32>
    %21 = vector.broadcast %20 : vector<16x1xf32> to vector<16x16xf32>
    %22 = arith.cmpf oeq, %12, %21 : vector<16x16xf32>
    %cst_12 = arith.constant 0x7F800000 : f32
    %23 = vector.broadcast %cst_12 : f32 to vector<16x16xf32>
    %24 = arith.select %22, %23, %10 : vector<16x16xi1>, vector<16x16xf32>
    %cst_13 = arith.constant dense<0x7F800000> : vector<16xf32>
    %25 = vector.multi_reduction <minimumf>, %24, %cst_13 [1] : vector<16x16xf32> to vector<16xf32>
    %26 = vector.shape_cast %25 : vector<16xf32> to vector<16x1xf32>
    %27 = vector.broadcast %26 : vector<16x1xf32> to vector<16x16xf32>
    %28 = arith.cmpf ole, %24, %27 : vector<16x16xf32>
    %cst_14 = arith.constant 1.600000e+01 : f32
    %29 = vector.broadcast %cst_14 : f32 to vector<16x16xf32>
    %30 = arith.select %28, %12, %29 : vector<16x16xi1>, vector<16x16xf32>
    %cst_15 = arith.constant dense<0x7F800000> : vector<16xf32>
    %31 = vector.multi_reduction <minimumf>, %30, %cst_15 [1] : vector<16x16xf32> to vector<16xf32>
    %32 = vector.shape_cast %31 : vector<16xf32> to vector<16x1xf32>
    %33 = vector.broadcast %32 : vector<16x1xf32> to vector<16x16xf32>
    %34 = arith.cmpf oeq, %12, %33 : vector<16x16xf32>
    %cst_16 = arith.constant 0x7F800000 : f32
    %35 = vector.broadcast %cst_16 : f32 to vector<16x16xf32>
    %36 = arith.select %34, %35, %24 : vector<16x16xi1>, vector<16x16xf32>
    %cst_17 = arith.constant dense<0x7F800000> : vector<16xf32>
    %37 = vector.multi_reduction <minimumf>, %36, %cst_17 [1] : vector<16x16xf32> to vector<16xf32>
    %38 = vector.shape_cast %37 : vector<16xf32> to vector<16x1xf32>
    %39 = vector.broadcast %38 : vector<16x1xf32> to vector<16x16xf32>
    %40 = arith.cmpf ole, %36, %39 : vector<16x16xf32>
    %cst_18 = arith.constant 1.600000e+01 : f32
    %41 = vector.broadcast %cst_18 : f32 to vector<16x16xf32>
    %42 = arith.select %40, %12, %41 : vector<16x16xi1>, vector<16x16xf32>
    %cst_19 = arith.constant dense<0x7F800000> : vector<16xf32>
    %43 = vector.multi_reduction <minimumf>, %42, %cst_19 [1] : vector<16x16xf32> to vector<16xf32>
    %44 = vector.shape_cast %43 : vector<16xf32> to vector<16x1xf32>
    %45 = vector.broadcast %44 : vector<16x1xf32> to vector<16x16xf32>
    %46 = arith.cmpf oeq, %12, %45 : vector<16x16xf32>
    %cst_20 = arith.constant 0x7F800000 : f32
    %47 = vector.broadcast %cst_20 : f32 to vector<16x16xf32>
    %48 = arith.select %46, %47, %36 : vector<16x16xi1>, vector<16x16xf32>
    %cst_21 = arith.constant dense<0x7F800000> : vector<16xf32>
    %49 = vector.multi_reduction <minimumf>, %48, %cst_21 [1] : vector<16x16xf32> to vector<16xf32>
    %50 = vector.shape_cast %49 : vector<16xf32> to vector<16x1xf32>
    %51 = vector.broadcast %50 : vector<16x1xf32> to vector<16x16xf32>
    %52 = arith.cmpf ole, %48, %51 : vector<16x16xf32>
    %cst_22 = arith.constant 1.600000e+01 : f32
    %53 = vector.broadcast %cst_22 : f32 to vector<16x16xf32>
    %54 = arith.select %52, %12, %53 : vector<16x16xi1>, vector<16x16xf32>
    %cst_23 = arith.constant dense<0x7F800000> : vector<16xf32>
    %55 = vector.multi_reduction <minimumf>, %54, %cst_23 [1] : vector<16x16xf32> to vector<16xf32>
    %56 = vector.shape_cast %55 : vector<16xf32> to vector<16x1xf32>
    %57 = tpu.concatenate %20, %32, %44, %56 in 1 : vector<16x1xf32>, vector<16x1xf32>, vector<16x1xf32>, vector<16x1xf32> -> vector<16x4xf32>
    %58 = arith.fptosi %57 : vector<16x4xf32> to vector<16x4xi32>
    %c0_24 = arith.constant 0 : index
    %c0_25 = arith.constant 0 : index
    %c0_26 = arith.constant 0 : index
    %59 = vector.load %arg5[%c0_24, %c0_25, %c0_26] : memref<1x16x4xi32, #tpu.memory_space<vmem>>, vector<1x16x4xi32>
    %60 = vector.shape_cast %59 : vector<1x16x4xi32> to vector<16x4xi32>
    %61 = vector.shape_cast %58 : vector<16x4xi32> to vector<1x16x4xi32>
    tpu.vector_store %arg5[%c0_24, %c0_25, %c0_26], %61 {strides = array<i32>} : memref<1x16x4xi32, #tpu.memory_space<vmem>>, vector<1x16x4xi32>,
    return
  }
  func.func @transform_0(%arg0: i32, %arg1: i32) -> (i32, i32, i32) {
    %c0_i32 = arith.constant 0 : i32
    %c0_i32_0 = arith.constant 0 : i32
    return %arg0, %arg1, %c0_i32 : i32, i32, i32
  }
  func.func @transform_1(%arg0: i32, %arg1: i32) -> (i32, i32, i32) {
    %c0_i32 = arith.constant 0 : i32
    %c0_i32_0 = arith.constant 0 : i32
    %c0_i32_1 = arith.constant 0 : i32
    return %arg0, %c0_i32, %c0_i32_0 : i32, i32, i32
  }
  func.func @transform_2(%arg0: i32, %arg1: i32) -> (i32, i32, i32) {
    %c0_i32 = arith.constant 0 : i32
    %c0_i32_0 = arith.constant 0 : i32
    %c0_i32_1 = arith.constant 0 : i32
    return %arg0, %c0_i32, %c0_i32_0 : i32, i32, i32
  }
  func.func @transform_3(%arg0: i32, %arg1: i32) -> (i32, i32, i32) {
    %c0_i32 = arith.constant 0 : i32
    %c0_i32_0 = arith.constant 0 : i32
    return %arg0, %arg1, %c0_i32 : i32, i32, i32
  }
}

</mosaic_0001>

<bundles_post_ra>
// kernel: tpu_custom_call.1
= control target key start
LH: loop header
LB: loop body
LE: loop exit
PB: predicated region body
PF: predicated region fallthrough
CT: control target
= control target key end

     0   :  { %s652_s12 = smov 0   ;;  %s654_s13 = smov 0   ;;  %s744_s0 = inlined_call_operand.vmem [shape: f32[2,16,3], index: 0, kind: input, shape index: {}]   ;;  %s745_s1 = inlined_call_operand.vmem [shape: f32[2,16,3], index: 1, kind: input, shape index: {}]   ;;  %s746_s2 = inlined_call_operand.vmem [shape: f32[2,1,16], index: 2, kind: input, shape index: {}]   ;;  %s747_s3 = inlined_call_operand.vmem [shape: s32[2,16,4], index: 3, kind: output, shape index: {}]  }
   0x1   :  { %s656_s14 = smov 0  }
   0x2 LB: > { %s25_s15 = sadd.s32 1, %s626_s13  ;;  %p552_p0 = scmp.ge.s32.totalorder %s630_s14, 1  ;;  %s630_s14 = sphi %s656_s14, %s13_s14   ;;  %s626_s13 = sphi %s654_s13, %s749_s13   ;;  %s622_s12 = sphi %s652_s12, %s748_s12  }
   0x3   : > { %p27_p1 = scmp.ge.s32.totalorder %s25_s15, 2  ;;  %p176_p2 = scmp.lt.s32.totalorder %s630_s14, 3 }
   0x5   : > { %s751_s15 = smov (%p27_p1, %s25_s15), 0  ;;  %p177_p3 = pnand %p552_p0, %p176_p2 }
   0x6   : > { %p217_p4 = scmp.lt.s32.totalorder (!%p177_p3), %s622_s12, 1 }
   0x7   : > { %180 = sbr.rel (%p177_p3) target bundleno = 1359 (0x54f), region = 32 }
   0xc   : > { %s753_s12 = smov (!%p217_p4, %s622_s12), 1  ;;  %vm248_vm0 = vcmask 23552   ;;  %vm350_vm1 = vcmask 130048   ;;  %v347_v13 = vlaneseq }
   0xd   : > { %s670_s16 = sshll.u32 %s753_s12, 4  ;;  %s233_s25 = scalar_lea.vmem %s746_s2, %s753_s12 }
   0xe   : > { %s230_s19 = scalar_lea.vmem %s745_s1, %s670_s16  ;;  %s224_s22 = scalar_lea.vmem %s744_s0, %s670_s16  ;;  %v563_v8 = vld [vmem:[%s233_s25] ss:$0 sm:$0xff]  ;;  %v348_v14 = vand.u32 127, %v347_v13 }
   0xf   : > { %v246_v0 = vld [vmem:[%s230_s19] sm:$0xff]  ;;  %v247_v1 = vld [vmem:[%s230_s19 + $0x8] sm:$0xff]  ;;  %s242_s28 = scalar_lea.vmem %s747_s3, %s670_s16 }
  0x10   : > { %573 = vmatprep.subr.msk.mxu0 %vm248_vm0, %v247_v1  ;;  %v244_v2 = vld [vmem:[%s224_s22] sm:$0xff]  ;;  %v245_v3 = vld [vmem:[%s224_s22 + $0x8] sm:$0xff]  ;;  %v691_v15 = vcvt.s32.f32 %v348_v14 }
  0x11   : > { %574 = vmatpush3.xpose.msk.msra.mxu0 %vm248_vm0, %v247_v1  ;;  %577 = vmatprep.mubr.msk.f32.mxu0 %vm248_vm0, %v244_v2 }
  0x12   : > { %575 = vmatprep.subr.msk.mxu0 %vm248_vm0, %v246_v0 }
  0x15   : > { %576 = vmatpush3.xpose.msk.msra.mxu0 %vm248_vm0, %v246_v0 }
  0x18   : > { %578 = vmatmul.mubr.msk.f32.vlgmr.msra.gmra.mxu0 %vm248_vm0, %v245_v3 }
  0xd8   : > { %v579_v4 = vpop.f32.mrf.mxu0 }
  0xd9   : > { %v338_v6 = vmul.f32 2.0, %v579_v4 }
  0xda   : > { %v327_v5 = vpop.f32.mrf.mxu0 }
  0xdb   : > { %v337_v7 = vmul.f32 2.0, %v327_v5  ;;  %v346_v10 = vsub.f32 %v563_v8, %v338_v6 }
  0xdd   : > { %v345_v9 = vsub.f32 %v563_v8, %v337_v7  ;;  %v354_v12 = vsel %vm350_vm1, %v346_v10, inf }
  0xdf   : > { %v351_v11 = vsel %vm350_vm1, %v345_v9, inf }
  0xe0   : > { %352 = vmin.xlane.f32.xlu0 %v351_v11 }
  0xe4   : > { %355 = vmin.xlane.f32.xlu0 %v354_v12 }
 0x169   : > { %v353_v16 = vpop.xlane.xlu0 %352 }
 0x16a   : > { %vm357_vm2 = vcmp.le.f32.partialorder %v345_v9, %v353_v16 }
 0x16b   : > { %v359_v17 = vsel %vm357_vm2, %v691_v15, 16.0  ;;  %vm427_vm2 = vcmask 7168  }
 0x16c   : > { %v361_v18 = vsel %vm350_vm1, %v359_v17, inf }
 0x16d   : > { %362 = vmin.xlane.f32.xlu1 %v361_v18  ;;  %v356_v19 = vpop.xlane.xlu0 %355 }
 0x16e   : > { %vm358_vm3 = vcmp.le.f32.partialorder %v346_v10, %v356_v19 }
 0x16f   : > { %v360_v20 = vsel %vm358_vm3, %v691_v15, 16.0  ;;  %vm430_vm3 = vcmask 15360  }
 0x170   : > { %v364_v21 = vsel %vm350_vm1, %v360_v20, inf }
 0x171   : > { %365 = vmin.xlane.f32.xlu1 %v364_v21 }
 0x1f6   : > { %v697_v22 = vpop.xlane.xlu1 %362 }
 0x1f7   : > { %vm367_vm4 = vcmp.eq.f32.partialorder %v691_v15, %v697_v22 }
 0x1f8   : > { %v369_v23 = vsel %vm367_vm4, inf, %v345_v9  ;;  %vm437_vm4 = vcmask 31744  }
 0x1f9   : > { %v371_v24 = vsel %vm350_vm1, %v369_v23, inf }
 0x1fa   : > { %372 = vmin.xlane.f32.xlu0 %v371_v24  ;;  %v702_v25 = vpop.xlane.xlu1 %365 }
 0x1fb   : > { %vm368_vm5 = vcmp.eq.f32.partialorder %v691_v15, %v702_v25 }
 0x1fc   : > { %v370_v26 = vsel %vm368_vm5, inf, %v346_v10 }
 0x1fd   : > { %v374_v27 = vsel %vm350_vm1, %v370_v26, inf }
 0x1fe   : > { %375 = vmin.xlane.f32.xlu1 %v374_v27 }
 0x283   : > { %v373_v28 = vpop.xlane.xlu0 %372 }
 0x284   : > { %vm377_vm6 = vcmp.le.f32.partialorder %v369_v23, %v373_v28 }
 0x285   : > { %v379_v29 = vsel %vm377_vm6, %v691_v15, 16.0 }
 0x286   : > { %v381_v30 = vsel %vm350_vm1, %v379_v29, inf }
 0x287   : > { %v376_v31 = vpop.xlane.xlu1 %375  ;;  %382 = vmin.xlane.f32.xlu0 %v381_v30 }
 0x288   : > { %vm378_vm7 = vcmp.le.f32.partialorder %v370_v26, %v376_v31 }
 0x289   : > { %v380_v32 = vsel %vm378_vm7, %v691_v15, 16.0 }
 0x28a   : > { %v384_v33 = vsel %vm350_vm1, %v380_v32, inf }
 0x28b   : > { %385 = vmin.xlane.f32.xlu1 %v384_v33 }
 0x310   : > { %v383_v34 = vpop.xlane.xlu0 %382 }
 0x311   : > { %vm387_vm8 = vcmp.eq.f32.partialorder %v691_v15, %v383_v34  ;;  %v428_v58 = vsel %vm427_vm2, %v697_v22, %v383_v34 }
 0x312   : > { %v389_v35 = vsel %vm387_vm8, inf, %v369_v23 }
 0x313   : > { %v391_v36 = vsel %vm350_vm1, %v389_v35, inf }
 0x314   : > { %v386_v37 = vpop.xlane.xlu1 %385  ;;  %392 = vmin.xlane.f32.xlu0 %v391_v36 }
 0x315   : > { %vm388_vm9 = vcmp.eq.f32.partialorder %v691_v15, %v386_v37  ;;  %v429_v63 = vsel %vm427_vm2, %v702_v25, %v386_v37 }
 0x316   : > { %v390_v38 = vsel %vm388_vm9, inf, %v370_v26 }
 0x317   : > { %v394_v39 = vsel %vm350_vm1, %v390_v38, inf }
 0x318   : > { %395 = vmin.xlane.f32.xlu1 %v394_v39 }
 0x39d   : > { %v393_v40 = vpop.xlane.xlu0 %392 }
 0x39e   : > { %vm397_vm10 = vcmp.le.f32.partialorder %v389_v35, %v393_v40 }
 0x39f   : > { %v399_v41 = vsel %vm397_vm10, %v691_v15, 16.0 }
 0x3a0   : > { %v401_v42 = vsel %vm350_vm1, %v399_v41, inf }
 0x3a1   : > { %v396_v43 = vpop.xlane.xlu1 %395  ;;  %402 = vmin.xlane.f32.xlu0 %v401_v42 }
 0x3a2   : > { %vm398_vm11 = vcmp.le.f32.partialorder %v390_v38, %v396_v43 }
 0x3a3   : > { %v400_v44 = vsel %vm398_vm11, %v691_v15, 16.0 }
 0x3a4   : > { %v404_v45 = vsel %vm350_vm1, %v400_v44, inf }
 0x3a5   : > { %405 = vmin.xlane.f32.xlu1 %v404_v45 }
 0x42a   : > { %v403_v46 = vpop.xlane.xlu0 %402 }
 0x42b   : > { %vm407_vm12 = vcmp.eq.f32.partialorder %v691_v15, %v403_v46  ;;  %v431_v59 = vsel %vm430_vm3, %v428_v58, %v403_v46 }
 0x42c   : > { %v409_v47 = vsel %vm407_vm12, inf, %v389_v35 }
 0x42d   : > { %v411_v48 = vsel %vm350_vm1, %v409_v47, inf }
 0x42e   : > { %v406_v49 = vpop.xlane.xlu1 %405  ;;  %412 = vmin.xlane.f32.xlu0 %v411_v48 }
 0x42f   : > { %vm408_vm13 = vcmp.eq.f32.partialorder %v691_v15, %v406_v49  ;;  %v432_v0 = vsel %vm430_vm3, %v429_v63, %v406_v49 }
 0x430   : > { %v410_v50 = vsel %vm408_vm13, inf, %v390_v38 }
 0x431   : > { %v414_v51 = vsel %vm350_vm1, %v410_v50, inf }
 0x432   : > { %415 = vmin.xlane.f32.xlu1 %v414_v51 }
 0x4b7   : > { %v413_v52 = vpop.xlane.xlu0 %412 }
 0x4b8   : > { %vm417_vm14 = vcmp.le.f32.partialorder %v409_v47, %v413_v52 }
 0x4b9   : > { %v419_v53 = vsel %vm417_vm14, %v691_v15, 16.0 }
 0x4ba   : > { %v421_v54 = vsel %vm350_vm1, %v419_v53, inf }
 0x4bb   : > { %v416_v55 = vpop.xlane.xlu1 %415  ;;  %422 = vmin.xlane.f32.xlu0 %v421_v54 }
 0x4bc   : > { %vm418_vm15 = vcmp.le.f32.partialorder %v410_v50, %v416_v55 }
 0x4bd   : > { %v420_v56 = vsel %vm418_vm15, %v691_v15, 16.0 }
 0x4be   : > { %v424_v57 = vsel %vm350_vm1, %v420_v56, inf }
 0x4bf   : > { %425 = vmin.xlane.f32.xlu1 %v424_v57 }
 0x544   : > { %v423_v60 = vpop.xlane.xlu0 %422 }
 0x545   : > { %v433_v61 = vsel %vm248_vm0, %v431_v59, %v423_v60 }
 0x546   : > { %v580_v62 = vtrunc.f32 %v433_v61 }
 0x548   : > { %v581_v1 = vcvt.f32.s32 %v580_v62  ;;  %v426_v2 = vpop.xlane.xlu1 %425 }
 0x549   : > { %v434_v3 = vsel %vm248_vm0, %v432_v0, %v426_v2 }
 0x54a   : > { %438 = vst.msk [vmem:[%s242_s28] sm:$0xff] %vm437_vm4, %v581_v1  ;;  %v582_v4 = vtrunc.f32 %v434_v3 }
 0x54c   : > { %v583_v5 = vcvt.f32.s32 %v582_v4 }
 0x54e   : > { %439 = vst.msk [vmem:[%s242_s28 + $0x8] sm:$0xff] %vm437_vm4, %v583_v5 }
 0x54f PF: > { %s13_s14 = sadd.s32 1, %s630_s14   ;;  %s748_s12 = smov %s626_s13 }
 0x550   : > { %p10_p5 = scmp.ge.s32.totalorder %s13_s14, 4   ;;  %s749_s13 = smov %s751_s15 }
 0x552   :  { %12 = sbr.rel (!%p10_p5) target bundleno = 2 (0x2), region = 68 }

</bundles_post_ra>
